<compile_context>
chip_gen: v5e
topology: v5e:2x2
jax: 0.10.0
libtpu: 0.0.40
codegen_flags: <defaults>
</compile_context>

<pallas_src>
import jax
import jax.numpy as jnp
from jax.experimental import pallas as pl
from jax.experimental.pallas import tpu as pltpu

H1 = 128          # first hidden width (from the PyTorch module)
H2 = 64           # second hidden width
LANE = 128        # lane-dense padded width used internally for the final layer
NEG_BIG = -1e30   # bias for padded softmax columns -> exp() == 0


# ----------------------------- Pallas kernel ------------------------------

def _mlp_softmax_kernel(x_ref, w1_ref, b1_ref, w2_ref, b2_ref, w3_ref, b3_ref,
                        o_ref):
    # Layer 1: (TILE_M, nz) @ (nz, 128) + b1, ReLU
    h = jnp.dot(x_ref[...], w1_ref[...],
                preferred_element_type=jnp.float32) + b1_ref[...]
    h = jnp.maximum(h, 0.0)
    # Layer 2: (TILE_M, 128) @ (128, 64) + b2, ReLU
    h = jnp.dot(h.astype(w2_ref.dtype), w2_ref[...],
                preferred_element_type=jnp.float32) + b2_ref[...]
    h = jnp.maximum(h, 0.0)
    # Layer 3 (padded to 128 lanes, vreg-resident only):
    #   (TILE_M, 64) @ (64, 128) + b3
    logits = jnp.dot(h.astype(w3_ref.dtype), w3_ref[...],
                     preferred_element_type=jnp.float32) + b3_ref[...]
    # Stable softmax over the padded last dim (padded lanes have bias -1e30,
    # so exp underflows to exactly 0 and the sum only covers real columns).
    m = jnp.max(logits, axis=-1, keepdims=True)
    e = jnp.exp(logits - m)
    s = jnp.sum(e, axis=-1, keepdims=True)
    # Reciprocal runs on the EUP slot (idle after the exp); exact mode keeps
    # 1e-5 parity with the f32 reference.  Divide would burn VALU slots.
    inv = pl.reciprocal(s, approx=False)
    probs = e * inv
    # Store only the real columns: the HBM output is (TILE_M, num_labs).
    o_ref[...] = probs[:, : o_ref.shape[-1]]


# --------------------------- one-time weight prep ---------------------------

def prepare_params(params, *, compute_dtype=jnp.float32):
    """Transpose/pad the PyTorch-layout weights once, outside the hot path.

    compute_dtype=jnp.bfloat16 enables the optional bf16-MXU path on v6e/v7x
    (biases and all epilogue math stay f32); default f32 matches PyTorch.
    """
    num_labs = int(params["fc3_w"].shape[0])
    assert num_labs <= LANE, f"num_labs={num_labs} must be <= {LANE}"

    # PyTorch Linear computes y = x @ W.T + b; store W.T for the kernel.
    w1 = params["fc1_w"].T.astype(compute_dtype)                 # (nz, 128)
    b1 = params["fc1_b"].reshape(1, H1).astype(jnp.float32)
    w2 = params["fc2_w"].T.astype(compute_dtype)                 # (128, 64)
    b2 = params["fc2_b"].reshape(1, H2).astype(jnp.float32)
    # Pad the final layer to 128 lanes for the in-vreg softmax; padded bias
    # columns get -1e30 so they contribute exactly 0 probability.
    w3 = jnp.zeros((H2, LANE), compute_dtype).at[:, :num_labs].set(
        params["fc3_w"].T.astype(compute_dtype))                 # (64, 128)
    b3 = jnp.full((1, LANE), NEG_BIG, jnp.float32).at[:, :num_labs].set(
        params["fc3_b"].astype(jnp.float32))
    return {
        "w1": w1, "b1": b1, "w2": w2, "b2": b2, "w3": w3, "b3": b3,
        "num_labs": num_labs, "compute_dtype": compute_dtype,
    }


# ------------------------------- JAX glue ----------------------------------

def latent_emotion_predict_forward(x, prep, *, tile_m=2048):
    """x: (N, nz).  Returns softmax probabilities (N, num_labs) in f32."""
    n, nz = x.shape
    num_labs = prep["num_labs"]
    compute_dtype = prep["compute_dtype"]

    # Tile the batch dimension: as large as VMEM comfortably allows (per-tile
    # footprint is ~1-3 MiB even double-buffered), but capped so large batches
    # always give grid_m >= 2 (shards across both v7x TensorCores) and rows
    # stay sublane (8) aligned.
    half = -(-n // 2)                                   # cdiv(n, 2)
    half_aligned = max(8, ((half + 7) // 8) * 8)
    tile_m = int(max(8, min(int(tile_m), half_aligned)))
    n_pad = ((n + tile_m - 1) // tile_m) * tile_m
    grid_m = n_pad // tile_m

    xp = jnp.pad(x.astype(jnp.float32), ((0, n_pad - n), (0, 0)))
    xp = xp.astype(compute_dtype)

    dt_bytes = jnp.dtype(compute_dtype).itemsize
    flops = 2 * n_pad * (nz * H1 + H1 * H2 + H2 * LANE) + 6 * n_pad * LANE
    transcendentals = n_pad * LANE
    bytes_accessed = (dt_bytes * (n_pad * nz + nz * H1 + H1 * H2 + H2 * LANE)
                      + 4 * (n_pad * num_labs + H1 + H2 + LANE))

    out = pl.pallas_call(
        _mlp_softmax_kernel,
        out_shape=jax.ShapeDtypeStruct((n_pad, num_labs), jnp.float32),
        grid_spec=pltpu.PrefetchScalarGridSpec(
            num_scalar_prefetch=0,
            grid=(grid_m,),
            in_specs=[
                pl.BlockSpec((tile_m, nz), lambda i: (i, 0)),   # activations
                pl.BlockSpec((nz, H1),     lambda i: (0, 0)),   # W1 (resident)
                pl.BlockSpec((1, H1),      lambda i: (0, 0)),   # b1
                pl.BlockSpec((H1, H2),     lambda i: (0, 0)),   # W2
                pl.BlockSpec((1, H2),      lambda i: (0, 0)),   # b2
                pl.BlockSpec((H2, LANE),   lambda i: (0, 0)),   # W3 (padded)
                pl.BlockSpec((1, LANE),    lambda i: (0, 0)),   # b3 (padded)
            ],
            # Narrow output block: last dim equals the full array dim, so the
            # (8,128) rule is satisfied and only num_labs columns hit HBM.
            out_specs=pl.BlockSpec((tile_m, num_labs), lambda i: (i, 0)),
        ),
        compiler_params=pltpu.CompilerParams(
            dimension_semantics=("parallel",),
            vmem_limit_bytes=64 * 1024 * 1024,
        ),
        cost_estimate=pl.CostEstimate(
            flops=flops,
            transcendentals=transcendentals,
            bytes_accessed=bytes_accessed,
        ),
    )(xp, prep["w1"], prep["b1"], prep["w2"], prep["b2"],
      prep["w3"], prep["b3"])

    # Strip batch padding (padded rows hold garbage softmax values).
    return out[:n]


# --------------------------- parameter creation -----------------------------

def init_params(cfg, key):
    nz, num_labs = cfg["nz"], cfg["num_labs"]
    k1, k2, k3 = jax.random.split(key, 3)

    def linear(k, fan_in, fan_out):
        bound = 1.0 / jnp.sqrt(jnp.float32(fan_in))
        kw, kb = jax.random.split(k)
        w = jax.random.uniform(kw, (fan_out, fan_in), jnp.float32, -bound, bound)
        b = jax.random.uniform(kb, (fan_out,), jnp.float32, -bound, bound)
        return w, b

    p = {}
    p["fc1_w"], p["fc1_b"] = linear(k1, nz, H1)
    p["fc2_w"], p["fc2_b"] = linear(k2, H1, H2)
    p["fc3_w"], p["fc3_b"] = linear(k3, H2, num_labs)
    return p


# --------------------------- pure-JAX reference -----------------------------

def _reference_forward(x, params):
    h = jnp.maximum(x @ params["fc1_w"].T + params["fc1_b"], 0.0)
    h = jnp.maximum(h @ params["fc2_w"].T + params["fc2_b"], 0.0)
    logits = h @ params["fc3_w"].T + params["fc3_b"]
    return jax.nn.softmax(logits, axis=-1)   # nn.Softmax() on 2-D input -> dim=1


# ---------------------------------- main ------------------------------------

if __name__ == "__main__":
    cfg = {"nz": 16, "num_labs": 7}
    batch = 2

    key = jax.random.PRNGKey(0)
    kx, kp = jax.random.split(key)
    x = jax.random.normal(kx, (batch, cfg["nz"]), jnp.float32)
    params = init_params(cfg, kp)

    # One-time weight prep (kept out of the jitted hot path).
    prep = prepare_params(params, compute_dtype=jnp.float32)

    fwd = jax.jit(lambda xx: latent_emotion_predict_forward(xx, prep))
    probs = fwd(x)
    jax.block_until_ready(probs)

    ref = _reference_forward(x, params)

    assert probs.shape == (batch, cfg["num_labs"])
    assert bool(jnp.all(jnp.isfinite(probs)))
    assert bool(jnp.allclose(jnp.sum(probs, axis=-1), 1.0, atol=1e-5))
    assert bool(jnp.allclose(probs, ref, atol=1e-5, rtol=1e-5))
    print("KERNEL_OK")
</pallas_src>

<mosaic_0001>
module attributes {stable_mosaic.version = 11 : i64} {
  func.func @_mlp_softmax_kernel(%arg0: i32, %arg1: memref<8x16xf32, #tpu.memory_space<vmem>>, %arg2: memref<16x128xf32, #tpu.memory_space<vmem>>, %arg3: memref<1x128xf32, #tpu.memory_space<vmem>>, %arg4: memref<128x64xf32, #tpu.memory_space<vmem>>, %arg5: memref<1x64xf32, #tpu.memory_space<vmem>>, %arg6: memref<64x128xf32, #tpu.memory_space<vmem>>, %arg7: memref<1x128xf32, #tpu.memory_space<vmem>>, %arg8: memref<8x7xf32, #tpu.memory_space<vmem>>) attributes {dimension_semantics = [#tpu.dimension_semantics<parallel>], iteration_bounds = array<i64: 1>, scalar_prefetch = 0 : i64, scratch_operands = 0 : i64, tpu.core_type = #tpu.core_type<tc>, window_params = [{transform_indices = @transform_0, window_bounds = array<i64: 8, 16>}, {pipeline_mode = #tpu.pipeline_mode<synchronous>, transform_indices = @transform_1, window_bounds = array<i64: 16, 128>}, {pipeline_mode = #tpu.pipeline_mode<synchronous>, transform_indices = @transform_2, window_bounds = array<i64: 1, 128>}, {pipeline_mode = #tpu.pipeline_mode<synchronous>, transform_indices = @transform_3, window_bounds = array<i64: 128, 64>}, {pipeline_mode = #tpu.pipeline_mode<synchronous>, transform_indices = @transform_4, window_bounds = array<i64: 1, 64>}, {pipeline_mode = #tpu.pipeline_mode<synchronous>, transform_indices = @transform_5, window_bounds = array<i64: 64, 128>}, {pipeline_mode = #tpu.pipeline_mode<synchronous>, transform_indices = @transform_6, window_bounds = array<i64: 1, 128>}, {transform_indices = @transform_7, window_bounds = array<i64: 8, 7>}]} {
    %c0 = arith.constant 0 : index
    %c0_0 = arith.constant 0 : index
    %0 = vector.load %arg1[%c0, %c0_0] : memref<8x16xf32, #tpu.memory_space<vmem>>, vector<8x16xf32>
    %c0_1 = arith.constant 0 : index
    %c0_2 = arith.constant 0 : index
    %1 = vector.load %arg2[%c0_1, %c0_2] : memref<16x128xf32, #tpu.memory_space<vmem>>, vector<16x128xf32>
    %cst = arith.constant dense<0.000000e+00> : vector<8x128xf32>
    %2 = tpu.matmul %0, %1, %cst {dimension_numbers = #tpu.dot_dimension_numbers<[1], [0], [0], [1], [0, 0, 1, 1], [], []>} : vector<8x16xf32>, vector<16x128xf32>, vector<8x128xf32> -> vector<8x128xf32>
    %c0_3 = arith.constant 0 : index
    %c0_4 = arith.constant 0 : index
    %3 = vector.load %arg3[%c0_3, %c0_4] : memref<1x128xf32, #tpu.memory_space<vmem>>, vector<1x128xf32>
    %4 = vector.broadcast %3 : vector<1x128xf32> to vector<8x128xf32>
    %5 = arith.addf %2, %4 : vector<8x128xf32>
    %cst_5 = arith.constant 0.000000e+00 : f32
    %6 = vector.broadcast %cst_5 : f32 to vector<8x128xf32>
    %7 = arith.maximumf %5, %6 : vector<8x128xf32>
    %c0_6 = arith.constant 0 : index
    %c0_7 = arith.constant 0 : index
    %8 = vector.load %arg4[%c0_6, %c0_7] : memref<128x64xf32, #tpu.memory_space<vmem>>, vector<128x64xf32>
    %cst_8 = arith.constant dense<0.000000e+00> : vector<8x64xf32>
    %9 = tpu.matmul %7, %8, %cst_8 {dimension_numbers = #tpu.dot_dimension_numbers<[1], [0], [0], [1], [0, 0, 1, 1], [], []>} : vector<8x128xf32>, vector<128x64xf32>, vector<8x64xf32> -> vector<8x64xf32>
    %c0_9 = arith.constant 0 : index
    %c0_10 = arith.constant 0 : index
    %10 = vector.load %arg5[%c0_9, %c0_10] : memref<1x64xf32, #tpu.memory_space<vmem>>, vector<1x64xf32>
    %11 = vector.broadcast %10 : vector<1x64xf32> to vector<8x64xf32>
    %12 = arith.addf %9, %11 : vector<8x64xf32>
    %cst_11 = arith.constant 0.000000e+00 : f32
    %13 = vector.broadcast %cst_11 : f32 to vector<8x64xf32>
    %14 = arith.maximumf %12, %13 : vector<8x64xf32>
    %c0_12 = arith.constant 0 : index
    %c0_13 = arith.constant 0 : index
    %15 = vector.load %arg6[%c0_12, %c0_13] : memref<64x128xf32, #tpu.memory_space<vmem>>, vector<64x128xf32>
    %cst_14 = arith.constant dense<0.000000e+00> : vector<8x128xf32>
    %16 = tpu.matmul %14, %15, %cst_14 {dimension_numbers = #tpu.dot_dimension_numbers<[1], [0], [0], [1], [0, 0, 1, 1], [], []>} : vector<8x64xf32>, vector<64x128xf32>, vector<8x128xf32> -> vector<8x128xf32>
    %c0_15 = arith.constant 0 : index
    %c0_16 = arith.constant 0 : index
    %17 = vector.load %arg7[%c0_15, %c0_16] : memref<1x128xf32, #tpu.memory_space<vmem>>, vector<1x128xf32>
    %18 = vector.broadcast %17 : vector<1x128xf32> to vector<8x128xf32>
    %19 = arith.addf %16, %18 : vector<8x128xf32>
    %cst_17 = arith.constant dense<0xFF800000> : vector<8xf32>
    %20 = vector.multi_reduction <maximumf>, %19, %cst_17 [1] : vector<8x128xf32> to vector<8xf32>
    %21 = vector.shape_cast %20 : vector<8xf32> to vector<8x1xf32>
    %22 = vector.broadcast %21 : vector<8x1xf32> to vector<8x128xf32>
    %23 = arith.subf %19, %22 : vector<8x128xf32>
    %24 = math.exp %23 : vector<8x128xf32>
    %cst_18 = arith.constant dense<0.000000e+00> : vector<8xf32>
    %25 = vector.multi_reduction <add>, %24, %cst_18 [1] : vector<8x128xf32> to vector<8xf32>
    %26 = vector.shape_cast %25 : vector<8xf32> to vector<8x1xf32>
    %27 = tpu.reciprocal %26 : vector<8x1xf32> -> vector<8x1xf32>
    %28 = vector.broadcast %27 : vector<8x1xf32> to vector<8x128xf32>
    %29 = arith.mulf %24, %28 : vector<8x128xf32>
    %30 = vector.extract_strided_slice %29 {offsets = [0, 0], sizes = [8, 7], strides = [1, 1]} : vector<8x128xf32> to vector<8x7xf32>
    %c0_19 = arith.constant 0 : index
    %c0_20 = arith.constant 0 : index
    %31 = vector.load %arg8[%c0_19, %c0_20] : memref<8x7xf32, #tpu.memory_space<vmem>>, vector<8x7xf32>
    tpu.vector_store %arg8[%c0_19, %c0_20], %30 {strides = array<i32>} : memref<8x7xf32, #tpu.memory_space<vmem>>, vector<8x7xf32>,
    return
  }
  func.func @transform_0(%arg0: i32) -> (i32, i32) {
    %c0_i32 = arith.constant 0 : i32
    %c0_i32_0 = arith.constant 0 : i32
    return %arg0, %c0_i32 : i32, i32
  }
  func.func @transform_1(%arg0: i32) -> (i32, i32) {
    %c0_i32 = arith.constant 0 : i32
    %c0_i32_0 = arith.constant 0 : i32
    %c0_i32_1 = arith.constant 0 : i32
    return %c0_i32, %c0_i32_0 : i32, i32
  }
  func.func @transform_2(%arg0: i32) -> (i32, i32) {
    %c0_i32 = arith.constant 0 : i32
    %c0_i32_0 = arith.constant 0 : i32
    %c0_i32_1 = arith.constant 0 : i32
    return %c0_i32, %c0_i32_0 : i32, i32
  }
  func.func @transform_3(%arg0: i32) -> (i32, i32) {
    %c0_i32 = arith.constant 0 : i32
    %c0_i32_0 = arith.constant 0 : i32
    %c0_i32_1 = arith.constant 0 : i32
    return %c0_i32, %c0_i32_0 : i32, i32
  }
  func.func @transform_4(%arg0: i32) -> (i32, i32) {
    %c0_i32 = arith.constant 0 : i32
    %c0_i32_0 = arith.constant 0 : i32
    %c0_i32_1 = arith.constant 0 : i32
    return %c0_i32, %c0_i32_0 : i32, i32
  }
  func.func @transform_5(%arg0: i32) -> (i32, i32) {
    %c0_i32 = arith.constant 0 : i32
    %c0_i32_0 = arith.constant 0 : i32
    %c0_i32_1 = arith.constant 0 : i32
    return %c0_i32, %c0_i32_0 : i32, i32
  }
  func.func @transform_6(%arg0: i32) -> (i32, i32) {
    %c0_i32 = arith.constant 0 : i32
    %c0_i32_0 = arith.constant 0 : i32
    %c0_i32_1 = arith.constant 0 : i32
    return %c0_i32, %c0_i32_0 : i32, i32
  }
  func.func @transform_7(%arg0: i32) -> (i32, i32) {
    %c0_i32 = arith.constant 0 : i32
    %c0_i32_0 = arith.constant 0 : i32
    return %arg0, %c0_i32 : i32, i32
  }
}

</mosaic_0001>

<bundles_post_ra>
// kernel: _lambda_.1
= control target key start
LH: loop header
LB: loop body
LE: loop exit
PB: predicated region body
PF: predicated region fallthrough
CT: control target
= control target key end

     0   :  { %12 = vsyncpa [#allocation3], 0  ;;  %s371_s0 = inlined_call_operand.vmem [shape: f32[8,16], index: 0, kind: input, shape index: {}]   ;;  %s372_s1 = inlined_call_operand.hbm [shape: f32[16,128], index: 1, kind: input, shape index: {}]   ;;  %s373_s2 = inlined_call_operand.vmem [shape: f32[1,128], index: 2, kind: input, shape index: {}]   ;;  %s374_s3 = inlined_call_operand.hbm [shape: f32[128,64], index: 3, kind: input, shape index: {}]   ;;  %s375_s4 = inlined_call_operand.vmem [shape: f32[1,64], index: 4, kind: input, shape index: {}]   ;;  %s376_s5 = inlined_call_operand.hbm [shape: f32[64,128], index: 5, kind: input, shape index: {}]   ;;  %s377_s6 = inlined_call_operand.vmem [shape: f32[1,128], index: 6, kind: input, shape index: {}]   ;;  %s378_s7 = inlined_call_operand.vmem [shape: f32[8,7], index: 7, kind: output, shape index: {}]  }
   0x1   :  { %13 = vsyncpa [#allocation5], 0  ;;  %s35_s26 = sshll.u32 %s374_s3, 4  ;;  %s302_s27 = smov [#allocation4]   ;;  %s36_s26 = int_to_ptr.hbm [resolvable:$true] %s35_s26 }
   0x2   :  { %s37_s28 = sshll.u32 %s302_s27, 4  ;;  %s20_s8 = sshll.u32 %s372_s1, 4  ;;  %s38_s28 = int_to_ptr.vmem [resolvable:$true] %s37_s28  ;;  %s21_s8 = int_to_ptr.hbm [resolvable:$true] %s20_s8 }
   0x3   :  { %s303_s9 = smov 128   ;;  %s304_s10 = smov 8  }
   0x4   :  { %43 = dma.hbm_to_vmem [thread:$0]  %s36_s26, 2048, %s38_s28, [#allocation5], %s303_s9, %s303_s9, %s304_s10  }
   0x5   :  { %s305_s11 = smov [#allocation2]   ;;  %s50_s15 = sshll.u32 %s376_s5, 4  ;;  %s51_s15 = int_to_ptr.hbm [resolvable:$true] %s50_s15 }
   0x6   :  { %s22_s12 = sshll.u32 %s305_s11, 4  ;;  %s306_s3 = smov [#allocation6]   ;;  %s23_s12 = int_to_ptr.vmem [resolvable:$true] %s22_s12 }
   0x7   :  { %28 = dma.hbm_to_vmem [thread:$0]  %s21_s8, 256, %s23_s12, [#allocation3], %s303_s9, %s303_s9, %s304_s10  }
   0x8   :  { %s52_s16 = sshll.u32 %s306_s3, 4  ;;  %s53_s16 = int_to_ptr.vmem [resolvable:$true] %s52_s16 }
   0x9   :  { %58 = dma.hbm_to_vmem [thread:$0]  %s51_s15, 1024, %s53_s16, [#allocation5], %s303_s9, %s303_s9, %s304_s10  }
   0xa   :  { %298 = dma.done.wait [#allocation3], 256  }
   0xb   :  { %299 = vsyncadd [#allocation3], 4294967040 }
   0xc   :  { %300 = dma.done.wait [#allocation5], 3072  }
   0xd   :  { %301 = vsyncadd [#allocation5], 4294964224  ;;  %v75_v0 = vld [vmem:[#allocation2 + $0x8] sm:$0xff]  ;;  %v74_v1 = vld [vmem:[#allocation2] sm:$0xff]  ;;  %vm80_vm0 = vcmask 130048   ;;  %vm158_vm1 = vcmask 523264  }
   0xe   :  { %98 = vmatpush.msra.mxu0 %v75_v0  ;;  %v73_v2 = vld [vmem:[%s371_s0] sm:$0xff]  ;;  %v120_v3 = vld [vmem:[#allocation4 + $0x78] sm:$0xff]  ;;  %v118_v5 = vld [vmem:[#allocation4 + $0x68] sm:$0xff]  ;;  %vm204_vm6 = vcmask 56320  }
   0xf   :  { %v119_v4 = vld [vmem:[#allocation4 + $0x70] sm:$0xff]  ;;  %125 = vmatpush.msra.mxu1 %v120_v3  ;;  %v117_v6 = vld [vmem:[#allocation4 + $0x60] sm:$0xff]  ;;  %v116_v7 = vld [vmem:[#allocation4 + $0x58] sm:$0xff] }
  0x10   :  { %99 = vmatpush.msra.mxu0 %v74_v1  ;;  %v115_v8 = vld [vmem:[#allocation4 + $0x50] sm:$0xff]  ;;  %v114_v9 = vld [vmem:[#allocation4 + $0x48] sm:$0xff]  ;;  %v113_v10 = vld [vmem:[#allocation4 + $0x40] sm:$0xff] }
  0x11   :  { %212 = vmatmul.msk.f32.vlgmr.msra.gmra.mxu0 %vm80_vm0, %v73_v2  ;;  %126 = vmatpush.msra.mxu1 %v119_v4  ;;  %v112_v11 = vld [vmem:[#allocation4 + $0x38] sm:$0xff]  ;;  %v111_v12 = vld [vmem:[#allocation4 + $0x30] sm:$0xff]  ;;  %v110_v13 = vld [vmem:[#allocation4 + $0x28] sm:$0xff] }
  0x12   :  { %v109_v14 = vld [vmem:[#allocation4 + $0x20] sm:$0xff]  ;;  %v108_v15 = vld [vmem:[#allocation4 + $0x18] sm:$0xff]  ;;  %v107_v16 = vld [vmem:[#allocation4 + $0x10] sm:$0xff] }
  0x13   :  { %127 = vmatpush.msra.mxu1 %v118_v5  ;;  %v106_v17 = vld [vmem:[#allocation4 + $0x8] sm:$0xff]  ;;  %v105_v18 = vld [vmem:[#allocation4] sm:$0xff]  ;;  %v153_v19 = vld [vmem:[#allocation6 + $0x38] sm:$0xff] }
  0x14   :  { %v152_v20 = vld [vmem:[#allocation6 + $0x30] sm:$0xff]  ;;  %170 = vmatpush.msra.mxu2 %v153_v19  ;;  %v151_v21 = vld [vmem:[#allocation6 + $0x28] sm:$0xff]  ;;  %v150_v22 = vld [vmem:[#allocation6 + $0x20] sm:$0xff] }
  0x15   :  { %128 = vmatpush.msra.mxu1 %v117_v6  ;;  %v149_v23 = vld [vmem:[#allocation6 + $0x18] sm:$0xff]  ;;  %v219_v24 = vld [vmem:[%s373_s2] ss:$0 sm:$0xff]  ;;  %v147_v29 = vld [vmem:[#allocation6 + $0x8] sm:$0xff] }
  0x16   :  { %171 = vmatpush.msra.mxu2 %v152_v20  ;;  %v148_v28 = vld [vmem:[#allocation6 + $0x10] sm:$0xff]  ;;  %v146_v30 = vld [vmem:[#allocation6] sm:$0xff] }
  0x17   :  { %129 = vmatpush.msra.mxu1 %v116_v7  ;;  %v220_v31 = vld [vmem:[%s375_s4] ss:$0 sm:$0xff] }
  0x18   :  { %172 = vmatpush.msra.mxu2 %v151_v21  ;;  %v221_v35 = vld [vmem:[%s377_s6] ss:$0 sm:$0xff] }
  0x19   :  { %130 = vmatpush.msra.mxu1 %v115_v8 }
  0x1a   :  { %173 = vmatpush.msra.mxu2 %v150_v22 }
  0x1b   :  { %131 = vmatpush.msra.mxu1 %v114_v9 }
  0x1c   :  { %174 = vmatpush.msra.mxu2 %v149_v23 }
  0x1d   :  { %132 = vmatpush.msra.mxu1 %v113_v10 }
  0x1e   :  { %175 = vmatpush.msra.mxu2 %v148_v28 }
  0x1f   :  { %133 = vmatpush.msra.mxu1 %v112_v11 }
  0x20   :  { %176 = vmatpush.msra.mxu2 %v147_v29 }
  0x21   :  { %134 = vmatpush.msra.mxu1 %v111_v12 }
  0x22   :  { %177 = vmatpush.msra.mxu2 %v146_v30 }
  0x23   :  { %135 = vmatpush.msra.mxu1 %v110_v13 }
  0x25   :  { %136 = vmatpush.msra.mxu1 %v109_v14 }
  0x27   :  { %137 = vmatpush.msra.mxu1 %v108_v15 }
  0x29   :  { %138 = vmatpush.msra.mxu1 %v107_v16 }
  0x2b   :  { %139 = vmatpush.msra.mxu1 %v106_v17 }
  0x2d   :  { %140 = vmatpush.msra.mxu1 %v105_v18 }
  0x8e   :  { %v101_v25 = vpop.f32.mrf.mxu0 }
  0x8f   :  { %v102_v26 = vadd.f32 %v219_v24, %v101_v25 }
  0x91   :  { %v104_v27 = vmax.f32 %v102_v26, 0.0 }
  0x93   :  { %141 = vmatmul.f32.vlgmr.msra.gmra.mxu1 %v104_v27 }
 0x110   :  { %v142_v32 = vpop.f32.mrf.mxu1 }
 0x111   :  { %v143_v33 = vadd.f32 %v220_v31, %v142_v32 }
 0x113   :  { %v145_v34 = vmax.f32 %v143_v33, 0.0 }
 0x115   :  { %213 = vmatmul.msk.f32.vlgmr.msra.gmra.mxu2 %vm158_vm1, %v145_v34 }
 0x198   :  { %v179_v36 = vpop.f32.mrf.mxu2 }
 0x199   :  { %v180_v37 = vadd.f32 %v221_v35, %v179_v36 }
 0x19b   :  { %182 = vmax.xlane.f32.xlu0 %v180_v37 }
 0x20e   :  { %v183_v38 = vpop.xlane.xlu0 %182 }
 0x20f   :  { %v184_v39 = vsub.f32 %v180_v37, %v183_v38 }
 0x211   :  { %v185_v40 = vmul.f32 1.442695, %v184_v39 }
 0x213   :  { %222 = vpow2.f32 %v185_v40 }
 0x219   :  { %v223_v41 = vpop.eup %222 }
 0x21a   :  { %187 = vadd.xlane.f32.xlu0 %v223_v41 }
 0x28d   :  { %v188_v42 = vpop.xlane.xlu0 %187 }
 0x28e   :  { %224 = vrcp.f32 %v188_v42  ;;  %v200_v46 = vand.u32 2147483648, %v188_v42  ;;  %v198_v48 = vand.u32 2147483647, %v188_v42  ;;  %vm194_vm3 = vweird.f32 %v188_v42 }
 0x290   :  { %v201_v50 = vor.u32 1.1754944e-38, %v200_v46  ;;  %vm199_vm5 = vcmp.eq.f32.partialorder %v198_v48, 8.507059e+37 }
 0x294   :  { %v225_v43 = vpop.eup %224 }
 0x295   :  { %v190_v44 = vmul.f32 %v225_v43, %v188_v42  ;;  %vm195_vm2 = vweird.f32 %v225_v43 }
 0x296   :  { %vm196_vm4 = vmor %vm194_vm3, %vm195_vm2 }
 0x297   :  { %v191_v45 = vsub.f32 1.0, %v190_v44 }
 0x299   :  { %v192_v47 = vmul.f32 %v225_v43, %v191_v45 }
 0x29b   :  { %v193_v49 = vadd.f32 %v225_v43, %v192_v47 }
 0x29d   :  { %v197_v51 = vsel %vm196_vm4, %v225_v43, %v193_v49 }
 0x29e   :  { %v202_v52 = vsel %vm199_vm5, %v201_v50, %v197_v51 }
 0x29f   :  { %v203_v53 = vmul.f32 %v223_v41, %v202_v52 }
 0x2a1   :  { %205 = vst.msk [vmem:[%s378_s7] sm:$0xff] %vm204_vm6, %v203_v53 }
 0x2a2   :  { %210 = vsyncpa [#allocation3], 1 }
 0x2a3   :  { %211 = vsyncpa [#allocation5], 1 }

</bundles_post_ra>
